<compile_context>
chip_gen: v7x
topology: tpu7x:2x2x1
jax: 0.10.0
libtpu: 0.0.40
codegen_flags: <defaults>
</compile_context>

<pallas_src>
import math

import jax
import jax.numpy as jnp
from jax.experimental import pallas as pl
from jax.experimental.pallas import tpu as pltpu

NUM_CLASSES = 10
K = 28 * 28              # 784 contraction dim (no padding)
N_PAD = 128              # lane-dense class dim
DEFAULT_TM = 1024        # batch tile (rows)


def netlin_kernel(x_ref, w_ref, b_ref, o_ref):
    # x_ref: (tm, 784) f32   w_ref: (784, 128) bf16
    # b_ref: (1, 128) f32    o_ref: (tm, 128) bf16
    x = x_ref[...].astype(jnp.bfloat16)            # cast under the DMA
    logits = jnp.dot(x, w_ref[...], preferred_element_type=jnp.float32)
    logits = logits + b_ref[...]
    # mask padded class columns so they do not pollute the log-sum-exp
    col = jax.lax.broadcasted_iota(jnp.int32, logits.shape, 1)
    logits = jnp.where(col < NUM_CLASSES, logits, -jnp.inf)
    # numerically-stable log_softmax over the class (lane) axis
    m = jnp.max(logits, axis=-1, keepdims=True)
    z = logits - m
    lse = jnp.log(jnp.sum(jnp.exp(z), axis=-1, keepdims=True))
    o_ref[...] = (z - lse).astype(o_ref.dtype)


def prepare_params(weight, bias):
    """One-time weight prep: transpose, pad classes 10->128, cast to bf16."""
    w_t = weight.T.astype(jnp.bfloat16)                          # (784, 10)
    w_p = jnp.zeros((K, N_PAD), jnp.bfloat16)
    w_p = w_p.at[:, :NUM_CLASSES].set(w_t)                       # (784, 128)
    b_p = jnp.zeros((1, N_PAD), jnp.float32)
    b_p = b_p.at[0, :NUM_CLASSES].set(bias.astype(jnp.float32))  # (1, 128)
    return w_p, b_p


def netlin_forward(x_nchw, w_p, b_p, *, tm=DEFAULT_TM):
    """x_nchw: (B, 1, 28, 28) f32; w_p: (784, 128) bf16; b_p: (1, 128) f32."""
    B = x_nchw.shape[0]
    # contiguous reshape is free; no astype, no pad, no extra HBM passes
    x_flat = x_nchw.reshape(B, K)

    # batch tile: full-extent block when B is small (legal even if B % 8 != 0),
    # otherwise 1024-row tiles with a ragged last tile (garbage rows sliced off)
    tm = B if B <= tm else tm
    grid = (pl.cdiv(B, tm),)

    cost = pl.CostEstimate(
        flops=2 * B * K * N_PAD,
        transcendentals=B * N_PAD,
        bytes_accessed=(x_flat.size * 4 + w_p.size * 2 + b_p.size * 4
                        + B * N_PAD * 2),
    )

    out = pl.pallas_call(
        netlin_kernel,
        out_shape=jax.ShapeDtypeStruct((B, N_PAD), jnp.bfloat16),
        grid=grid,
        in_specs=[
            pl.BlockSpec((tm, K), lambda i: (i, 0)),
            pl.BlockSpec((K, N_PAD), lambda i: (0, 0)),
            pl.BlockSpec((1, N_PAD), lambda i: (0, 0)),
        ],
        out_specs=pl.BlockSpec((tm, N_PAD), lambda i: (i, 0)),
        compiler_params=pltpu.CompilerParams(
            dimension_semantics=("parallel",)
        ),
        cost_estimate=cost,
    )(x_flat, w_p, b_p)

    # consumer-facing slice (downstream argmax/NLL could fuse or skip this)
    return out[:B, :NUM_CLASSES]


def init_params(key):
    """Deterministic nn.Linear(784, 10) init: U(-1/sqrt(784), 1/sqrt(784))."""
    in_features, out_features = K, NUM_CLASSES
    bound = 1.0 / math.sqrt(in_features)
    kw, kb = jax.random.split(key)
    weight = jax.random.uniform(
        kw, (out_features, in_features), jnp.float32, -bound, bound
    )
    bias = jax.random.uniform(
        kb, (out_features,), jnp.float32, -bound, bound
    )
    return weight, bias


if __name__ == "__main__":
    key = jax.random.PRNGKey(0)
    k_params, k_input = jax.random.split(key)

    weight, bias = init_params(k_params)
    w_p, b_p = prepare_params(weight, bias)      # hoisted out of the hot path

    B = 8
    x = jax.random.normal(k_input, (B, 1, 28, 28), jnp.float32)  # NCHW

    out = netlin_forward(x, w_p, b_p)
    out = jax.block_until_ready(out)

    # sanity check against plain-JAX f32 reference (bf16 weights / bf16 output
    # in the kernel => loosened tolerance)
    ref = jax.nn.log_softmax(x.reshape(B, -1) @ weight.T + bias, axis=-1)
    assert out.shape == (B, NUM_CLASSES)
    assert jnp.all(jnp.isfinite(out))
    assert jnp.allclose(out.astype(jnp.float32), ref, atol=5e-2, rtol=5e-2)

    print("KERNEL_OK")
</pallas_src>

<mosaic_0001>
module attributes {stable_mosaic.version = 11 : i64} {
  func.func @netlin_kernel(%arg0: i32, %arg1: memref<8x784xf32, #tpu.memory_space<vmem>>, %arg2: memref<784x128xbf16, #tpu.memory_space<vmem>>, %arg3: memref<1x128xf32, #tpu.memory_space<vmem>>, %arg4: memref<8x128xbf16, #tpu.memory_space<vmem>>) attributes {dimension_semantics = [#tpu.dimension_semantics<parallel>], iteration_bounds = array<i64: 1>, scalar_prefetch = 0 : i64, scratch_operands = 0 : i64, tpu.core_type = #tpu.core_type<tc>, window_params = [{transform_indices = @transform_0, window_bounds = array<i64: 8, 784>}, {pipeline_mode = #tpu.pipeline_mode<synchronous>, transform_indices = @transform_1, window_bounds = array<i64: 784, 128>}, {pipeline_mode = #tpu.pipeline_mode<synchronous>, transform_indices = @transform_2, window_bounds = array<i64: 1, 128>}, {transform_indices = @transform_3, window_bounds = array<i64: 8, 128>}]} {
    %c0 = arith.constant 0 : index
    %c0_0 = arith.constant 0 : index
    %0 = vector.load %arg1[%c0, %c0_0] : memref<8x784xf32, #tpu.memory_space<vmem>>, vector<8x784xf32>
    %1 = arith.truncf %0 : vector<8x784xf32> to vector<8x784xbf16>
    %c0_1 = arith.constant 0 : index
    %c0_2 = arith.constant 0 : index
    %2 = vector.load %arg2[%c0_1, %c0_2] : memref<784x128xbf16, #tpu.memory_space<vmem>>, vector<784x128xbf16>
    %cst = arith.constant dense<0.000000e+00> : vector<8x128xf32>
    %3 = tpu.matmul %1, %2, %cst {dimension_numbers = #tpu.dot_dimension_numbers<[1], [0], [0], [1], [0, 0, 1, 1], [], []>} : vector<8x784xbf16>, vector<784x128xbf16>, vector<8x128xf32> -> vector<8x128xf32>
    %c0_3 = arith.constant 0 : index
    %c0_4 = arith.constant 0 : index
    %4 = vector.load %arg3[%c0_3, %c0_4] : memref<1x128xf32, #tpu.memory_space<vmem>>, vector<1x128xf32>
    %5 = vector.broadcast %4 : vector<1x128xf32> to vector<8x128xf32>
    %6 = arith.addf %3, %5 : vector<8x128xf32>
    %7 = tpu.iota {dimensions = array<i32: 1>} : vector<8x128xi32>
    %c10_i32 = arith.constant 10 : i32
    %8 = vector.broadcast %c10_i32 : i32 to vector<8x128xi32>
    %9 = arith.cmpi slt, %7, %8 : vector<8x128xi32>
    %cst_5 = arith.constant 0xFF800000 : f32
    %10 = vector.broadcast %cst_5 : f32 to vector<8x128xf32>
    %11 = arith.select %9, %6, %10 : vector<8x128xi1>, vector<8x128xf32>
    %cst_6 = arith.constant dense<0xFF800000> : vector<8xf32>
    %12 = vector.multi_reduction <maximumf>, %11, %cst_6 [1] : vector<8x128xf32> to vector<8xf32>
    %13 = vector.shape_cast %12 : vector<8xf32> to vector<8x1xf32>
    %14 = vector.broadcast %13 : vector<8x1xf32> to vector<8x128xf32>
    %15 = arith.subf %11, %14 : vector<8x128xf32>
    %16 = math.exp %15 : vector<8x128xf32>
    %cst_7 = arith.constant dense<0.000000e+00> : vector<8xf32>
    %17 = vector.multi_reduction <add>, %16, %cst_7 [1] : vector<8x128xf32> to vector<8xf32>
    %18 = vector.shape_cast %17 : vector<8xf32> to vector<8x1xf32>
    %19 = math.log %18 : vector<8x1xf32>
    %20 = vector.broadcast %19 : vector<8x1xf32> to vector<8x128xf32>
    %21 = arith.subf %15, %20 : vector<8x128xf32>
    %22 = arith.truncf %21 : vector<8x128xf32> to vector<8x128xbf16>
    %c0_8 = arith.constant 0 : index
    %c0_9 = arith.constant 0 : index
    %23 = vector.load %arg4[%c0_8, %c0_9] : memref<8x128xbf16, #tpu.memory_space<vmem>>, vector<8x128xbf16>
    tpu.vector_store %arg4[%c0_8, %c0_9], %22 {strides = array<i32>} : memref<8x128xbf16, #tpu.memory_space<vmem>>, vector<8x128xbf16>,
    return
  }
  func.func @transform_0(%arg0: i32) -> (i32, i32) {
    %c0_i32 = arith.constant 0 : i32
    %c0_i32_0 = arith.constant 0 : i32
    return %arg0, %c0_i32 : i32, i32
  }
  func.func @transform_1(%arg0: i32) -> (i32, i32) {
    %c0_i32 = arith.constant 0 : i32
    %c0_i32_0 = arith.constant 0 : i32
    %c0_i32_1 = arith.constant 0 : i32
    return %c0_i32, %c0_i32_0 : i32, i32
  }
  func.func @transform_2(%arg0: i32) -> (i32, i32) {
    %c0_i32 = arith.constant 0 : i32
    %c0_i32_0 = arith.constant 0 : i32
    %c0_i32_1 = arith.constant 0 : i32
    return %c0_i32, %c0_i32_0 : i32, i32
  }
  func.func @transform_3(%arg0: i32) -> (i32, i32) {
    %c0_i32 = arith.constant 0 : i32
    %c0_i32_0 = arith.constant 0 : i32
    return %arg0, %c0_i32 : i32, i32
  }
}

</mosaic_0001>

<bundles_post_ra>
// kernel: tpu_custom_call.1
= control target key start
LH: loop header
LB: loop body
LE: loop exit
PB: predicated region body
PF: predicated region fallthrough
CT: control target
= control target key end

     0   :  { %8 = vsyncpa [#allocation3], 0  ;;  %s981_s0 = inlined_call_operand.hbm [shape: f32[8,784], index: 0, kind: input, shape index: {}]   ;;  %s982_s1 = inlined_call_operand.hbm [shape: bf16[784,128], index: 1, kind: input, shape index: {}]   ;;  %s983_s2 = inlined_call_operand.vmem [shape: f32[1,128], index: 2, kind: input, shape index: {}]   ;;  %s984_s3 = inlined_call_operand.hbm [shape: bf16[8,128], index: 3, kind: output, shape index: {}]  }
   0x1   :  { %9 = vsyncpa [#allocation6], 0 }
   0x2   :  { %10 = vsyncpa [#allocation4], 0  ;;  %s908_s12 = smov [#allocation2]   ;;  %s909_s14 = smov [#allocation5]  }
   0x3   :  { %s17_s13 = sshll.u32 %s908_s12, 4  ;;  %s26_s15 = sshll.u32 %s909_s14, 4  ;;  %s18_s13 = int_to_ptr.vmem [resolvable:$true] %s17_s13  ;;  %s935_s15 = int_to_ptr.vmem [resolvable:$true] %s26_s15 }
   0x4   :  { %s836_s18 = scalar_lea.hbm %s981_s0, 896 }
   0x5   :  { %p837_p0 = scmp.ne.s32.totalorder %s981_s0, %s836_s18  ;;  %p840_p1 = scmp.lt.u32.totalorder %s836_s18, %s981_s0 }
   0x7   :  { %p842_p2 = pnand %p840_p1, %p837_p0 }
   0x9   :  { %845 = shalt.err (!%p842_p2)
}
   0xa   :  { %s846_s23 = scalar_lea.vmem %s18_s13, 896  ;;  %p851_p4 = scmp.lt.s32.totalorder %s18_s13, %s18_s13 }
   0xb   :  { %p847_p3 = scmp.ne.s32.totalorder %s18_s13, %s846_s23  ;;  %p852_p5 = scmp.lt.s32.totalorder %s846_s23, %s846_s23 }
   0xd   :  { %p853_p6 = por %p852_p5, %p851_p4 }
   0xf   :  { %p854_p7 = pnand %p853_p6, %p847_p3 }
  0x11   :  { %857 = shalt.err (!%p854_p7)
}
  0x12   :  { %20 = dma.hbm_to_vmem [thread:$0]  %s981_s0, 896, %s18_s13, [#allocation3]  }
  0x13   :  { %s858_s28 = scalar_lea.hbm %s982_s1, 6272 }
  0x14   :  { %p859_p8 = scmp.ne.s32.totalorder %s982_s1, %s858_s28  ;;  %p862_p9 = scmp.lt.u32.totalorder %s858_s28, %s982_s1 }
  0x16   :  { %p864_p10 = pnand %p862_p9, %p859_p8 }
  0x18   :  { %867 = shalt.err (!%p864_p10)
}
  0x19   :  { %s868_s6 = scalar_lea.vmem %s935_s15, 6272  ;;  %p873_p12 = scmp.lt.s32.totalorder %s935_s15, %s935_s15 }
  0x1a   :  { %p869_p11 = scmp.ne.s32.totalorder %s935_s15, %s868_s6  ;;  %p874_p13 = scmp.lt.s32.totalorder %s868_s6, %s868_s6 }
  0x1c   :  { %p875_p0 = por %p874_p13, %p873_p12 }
  0x1e   :  { %p876_p1 = pnand %p875_p0, %p869_p11 }
  0x20   :  { %879 = shalt.err (!%p876_p1)
}
  0x21   :  { %s910_s0 = smov 64   ;;  %s911_s7 = smov 4  }
  0x22   :  { %32 = dma.hbm_to_vmem [thread:$0]  %s982_s1, 6272, %s935_s15, [#allocation6], %s910_s0, %s910_s0, %s911_s7  }
  0x23   :  { %902 = dma.done.wait [#allocation3], 896  }
  0x24   :  { %903 = vsyncadd [#allocation3], 4294966400 }
  0x25   :  { %904 = dma.done.wait [#allocation6], 6272  }
  0x26   :  { %905 = vsyncadd [#allocation6], 4294961024  ;;  %v783_v0 = vld [vmem:[#allocation5 + $0x40] sm:$0xff]   ;;  %v787_v4 = vld [vmem:[#allocation5 + $0x48] sm:$0xff]   ;;  %v912_v44 = vmov 0.0   ;;  %vm913_vm0 = vmmov 0  }
  0x27   :  { %v784_v1 = vld [vmem:[#allocation5] sm:$0xff]   ;;  %702 = vmatprep.subr.bf16.mxu0 %v783_v0  ;;  %v788_v5 = vld [vmem:[#allocation5 + $0x8] sm:$0xff]   ;;  %v791_v8 = vld [vmem:[#allocation5 + $0x50] sm:$0xff]   ;;  %vm455_vm1 = vcmask 130048  }
  0x28   :  { %v785_v2 = vld [vmem:[#allocation5 + $0xc0] sm:$0xff]   ;;  %703 = vmatpush3.bf16.msra.mxu0 %v784_v1  ;;  %v789_v6 = vld [vmem:[#allocation5 + $0xc8] sm:$0xff]   ;;  %v792_v9 = vld [vmem:[#allocation5 + $0x10] sm:$0xff]  }
  0x29   :  { %v786_v3 = vld [vmem:[#allocation5 + $0x80] sm:$0xff]   ;;  %724 = vmatprep.subr.bf16.mxu1 %v785_v2  ;;  %704 = vmatprep.subr.bf16.mxu0 %v787_v4  ;;  %v790_v7 = vld [vmem:[#allocation5 + $0x88] sm:$0xff]   ;;  %v793_v10 = vld [vmem:[#allocation5 + $0xd0] sm:$0xff]  }
  0x2a   :  { %725 = vmatpush3.bf16.msra.mxu1 %v786_v3  ;;  %v794_v11 = vld [vmem:[#allocation5 + $0x90] sm:$0xff]   ;;  %v795_v12 = vld [vmem:[#allocation5 + $0x58] sm:$0xff]   ;;  %v799_v16 = vld [vmem:[#allocation5 + $0x60] sm:$0xff]  }
  0x2b   :  { %726 = vmatprep.subr.bf16.mxu1 %v789_v6  ;;  %v796_v13 = vld [vmem:[#allocation5 + $0x18] sm:$0xff]   ;;  %v800_v17 = vld [vmem:[#allocation5 + $0x20] sm:$0xff]   ;;  %v803_v20 = vld [vmem:[#allocation5 + $0x68] sm:$0xff]  }
  0x2c   :  { %705 = vmatpush3.bf16.msra.mxu0 %v788_v5  ;;  %v797_v14 = vld [vmem:[#allocation5 + $0xd8] sm:$0xff]   ;;  %v801_v18 = vld [vmem:[#allocation5 + $0xe0] sm:$0xff]   ;;  %v804_v21 = vld [vmem:[#allocation5 + $0x28] sm:$0xff]  }
  0x2d   :  { %706 = vmatprep.subr.bf16.mxu0 %v791_v8  ;;  %v798_v15 = vld [vmem:[#allocation5 + $0x98] sm:$0xff]   ;;  %v802_v19 = vld [vmem:[#allocation5 + $0xa0] sm:$0xff]   ;;  %v805_v22 = vld [vmem:[#allocation5 + $0xe8] sm:$0xff]  }
  0x2e   :  { %727 = vmatpush3.bf16.msra.mxu1 %v790_v7  ;;  %v806_v23 = vld [vmem:[#allocation5 + $0xa8] sm:$0xff]   ;;  %v807_v24 = vld [vmem:[#allocation5 + $0x70] sm:$0xff]   ;;  %v811_v28 = vld [vmem:[#allocation5 + $0x78] sm:$0xff]  }
  0x2f   :  { %728 = vmatprep.subr.bf16.mxu1 %v793_v10  ;;  %v808_v25 = vld [vmem:[#allocation5 + $0x30] sm:$0xff]   ;;  %v812_v29 = vld [vmem:[#allocation5 + $0x38] sm:$0xff]   ;;  %v42_v34 = vld [vmem:[#allocation2] sm:$0xff] }
  0x30   :  { %707 = vmatpush3.bf16.msra.mxu0 %v792_v9  ;;  %v809_v26 = vld [vmem:[#allocation5 + $0xf0] sm:$0xff]   ;;  %v813_v30 = vld [vmem:[#allocation5 + $0xf8] sm:$0xff]   ;;  %v49_v35 = vpack.c.bf16 %v42_v34, %v42_v34  ;;  %v815_v36 = vld [vmem:[#allocation5 + $0x140] sm:$0xff]  }
  0x31   :  { %708 = vmatprep.subr.bf16.mxu0 %v795_v12  ;;  %v810_v27 = vld [vmem:[#allocation5 + $0xb0] sm:$0xff]   ;;  %v814_v33 = vld [vmem:[#allocation5 + $0xb8] sm:$0xff]   ;;  %v45_v37 = vld [vmem:[#allocation2 + $0x18] sm:$0xff] }
  0x32   :  { %729 = vmatpush3.bf16.msra.mxu1 %v794_v11  ;;  %v43_v31 = vld [vmem:[#allocation2 + $0x8] sm:$0xff]  ;;  %v52_v38 = vpack.c.bf16 %v45_v37, %v45_v37  ;;  %v816_v39 = vld [vmem:[#allocation5 + $0x100] sm:$0xff]   ;;  %v44_v40 = vld [vmem:[#allocation2 + $0x10] sm:$0xff] }
  0x33   :  { %730 = vmatprep.subr.bf16.mxu1 %v797_v14  ;;  %v50_v32 = vpack.c.bf16 %v43_v31, %v43_v31  ;;  %v51_v41 = vpack.c.bf16 %v44_v40, %v44_v40  ;;  %v817_v42 = vld [vmem:[#allocation5 + $0x148] sm:$0xff]   ;;  %v819_v45 = vld [vmem:[#allocation5 + $0x150] sm:$0xff]   ;;  %v821_v47 = vld [vmem:[#allocation5 + $0x158] sm:$0xff]  }
  0x34   :  { %709 = vmatpush3.bf16.msra.mxu0 %v796_v13  ;;  %531 = vmatprep.mubr.bf16.mxu1 %v52_v38  ;;  %v818_v43 = vld [vmem:[#allocation5 + $0x108] sm:$0xff]   ;;  %v820_v46 = vld [vmem:[#allocation5 + $0x110] sm:$0xff]   ;;  %v822_v48 = vld [vmem:[#allocation5 + $0x118] sm:$0xff]  }
  0x35   :  { %710 = vmatprep.subr.bf16.mxu0 %v799_v16  ;;  %491 = vmatprep.mubr.bf16.mxu0 %v50_v32  ;;  %v823_v49 = vld [vmem:[#allocation5 + $0x160] sm:$0xff]   ;;  %v825_v51 = vld [vmem:[#allocation5 + $0x168] sm:$0xff]   ;;  %v47_v53 = vld [vmem:[#allocation2 + $0x28] sm:$0xff] }
  0x36   :  { %731 = vmatpush3.bf16.msra.mxu1 %v798_v15  ;;  %v824_v50 = vld [vmem:[#allocation5 + $0x120] sm:$0xff]   ;;  %v54_v54 = vpack.c.bf16 %v47_v53, %v47_v53  ;;  %v48_v55 = vld [vmem:[#allocation2 + $0x30] sm:$0xff]  ;;  %v826_v56 = vld [vmem:[#allocation5 + $0x128] sm:$0xff]  }
  0x37   :  { %732 = vmatprep.subr.bf16.mxu1 %v801_v18  ;;  %v831_v52 = vld [vmem:[#allocation5 + $0x180] sm:$0xff]   ;;  %v55_v57 = vpack.c.bf16 %v48_v55, %v48_v55  ;;  %v827_v58 = vld [vmem:[#allocation5 + $0x170] sm:$0xff]   ;;  %v829_v60 = vld [vmem:[#allocation5 + $0x178] sm:$0xff]  }
  0x38   :  { %711 = vmatpush3.bf16.msra.mxu0 %v800_v17  ;;  %v828_v59 = vld [vmem:[#allocation5 + $0x130] sm:$0xff]   ;;  %v830_v61 = vld [vmem:[#allocation5 + $0x138] sm:$0xff]   ;;  %v46_v62 = vld [vmem:[#allocation2 + $0x20] sm:$0xff]  ;;  %v619_v17 = vlaneseq }
  0x39   :  { %712 = vmatprep.subr.bf16.mxu0 %v803_v20  ;;  %v53_v63 = vpack.c.bf16 %v46_v62, %v46_v62  ;;  %v651_v1 = vld [vmem:[%s983_s2] ss:$0 sm:$0xff]  ;;  %s914_s2 = smov [#allocation7]  }
  0x3a   :  { %733 = vmatpush3.bf16.msra.mxu1 %v802_v19  ;;  %v620_v20 = vand.u32 127, %v619_v17  ;;  %s641_s11 = sshll.u32 %s914_s2, 4  ;;  %s642_s11 = int_to_ptr.vmem [resolvable:$true] %s641_s11 }
  0x3b   :  { %734 = vmatprep.subr.bf16.mxu1 %v805_v22  ;;  %s880_s12 = scalar_lea.vmem %s642_s11, 64  ;;  %p885_p3 = scmp.lt.s32.totalorder %s642_s11, %s642_s11 }
  0x3c   :  { %713 = vmatpush3.bf16.msra.mxu0 %v804_v21  ;;  %vm621_vm2 = vcmp.lt.s32.totalorder %v620_v20, 10  ;;  %p881_p2 = scmp.ne.s32.totalorder %s642_s11, %s880_s12  ;;  %p886_p4 = scmp.lt.s32.totalorder %s880_s12, %s880_s12 }
  0x3d   :  { %714 = vmatprep.subr.bf16.mxu0 %v807_v24 }
  0x3e   :  { %735 = vmatpush3.bf16.msra.mxu1 %v806_v23  ;;  %p887_p5 = por %p886_p4, %p885_p3 }
  0x3f   :  { %736 = vmatprep.subr.bf16.mxu1 %v809_v26 }
  0x40   :  { %715 = vmatpush3.bf16.msra.mxu0 %v808_v25  ;;  %p888_p6 = pnand %p887_p5, %p881_p2 }
  0x41   :  { %716 = vmatprep.subr.bf16.mxu0 %v811_v28 }
  0x42   :  { %737 = vmatpush3.bf16.msra.mxu1 %v810_v27 }
  0x43   :  { %738 = vmatprep.subr.bf16.mxu1 %v813_v30 }
  0x44   :  { %717 = vmatpush3.bf16.msra.mxu0 %v812_v29 }
  0x45   :  { %746 = vmatprep.subr.bf16.mxu0 %v815_v36 }
  0x46   :  { %739 = vmatpush3.bf16.msra.mxu1 %v814_v33 }
  0x47   :  { %492 = vmatmul.mubr.bf16.vlgmr.msra.gmra.mrb[0].mxu0 %v49_v35  ;;  %770 = vmatprep.subr.bf16.mxu1 %v912_v44 }
  0x48   :  { %747 = vmatpush3.bf16.msra.mxu0 %v816_v39  ;;  %571 = vmatprep.mubr.bf16.mxu0 %v54_v54 }
  0x49   :  { %532 = vmatmul.mubr.bf16.vlgmr.msra.gmra.mrb[0].mxu1 %v51_v41  ;;  %748 = vmatprep.subr.bf16.mxu0 %v817_v42 }
  0x4a   :  { %772 = vmatprep.mubr.msk.bf16.mxu1 %vm913_vm0, %v912_v44  ;;  %771 = vmatpush3.bf16.msra.mxu1 %v831_v52 }
  0x4c   :  { %749 = vmatpush3.bf16.msra.mxu0 %v818_v43 }
  0x4d   :  { %750 = vmatprep.subr.bf16.mxu0 %v819_v45 }
  0x50   :  { %751 = vmatpush3.bf16.msra.mxu0 %v820_v46 }
  0x51   :  { %752 = vmatprep.subr.bf16.mxu0 %v821_v47  ;;  %773 = vmatmul.mubr.msk.bf16.vlgmr.msra.gmra.mrb[4].mxu1 %vm455_vm1, %v55_v57 }
  0x54   :  { %753 = vmatpush3.bf16.msra.mxu0 %v822_v48 }
  0x55   :  { %754 = vmatprep.subr.bf16.mxu0 %v823_v49 }
  0x58   :  { %755 = vmatpush3.bf16.msra.mxu0 %v824_v50 }
  0x59   :  { %756 = vmatprep.subr.bf16.mxu0 %v825_v51 }
  0x5c   :  { %757 = vmatpush3.bf16.msra.mxu0 %v826_v56 }
  0x5d   :  { %758 = vmatprep.subr.bf16.mxu0 %v827_v58 }
  0x60   :  { %759 = vmatpush3.bf16.msra.mxu0 %v828_v59 }
  0x61   :  { %760 = vmatprep.subr.bf16.mxu0 %v829_v60 }
  0x64   :  { %761 = vmatpush3.bf16.msra.mxu0 %v830_v61 }
  0x67   :  { %572 = vmatmul.mubr.bf16.vlgmr.msra.gmra.mrb[4].mxu0 %v53_v63 }
 0x11a   :  { %v718_v0 = vpop.f32.mrb[0].mxu0 }
 0x11b   :  { %v719_v2 = vpop.f32.mrb[1].mxu0 }
 0x11c   :  { %v720_v3 = vadd.f32 %v719_v2, %v718_v0  ;;  %v721_v4 = vpop.f32.mrb[2].mxu0  ;;  %v740_v5 = vpop.f32.mrb[0].mxu1 }
 0x11d   :  { %v722_v6 = vpop.f32.mrb[3].mxu0  ;;  %v741_v8 = vpop.f32.mrb[1].mxu1 }
 0x11e   :  { %v494_v7 = vadd.f32 %v720_v3, %v651_v1  ;;  %v742_v9 = vadd.f32 %v741_v8, %v740_v5  ;;  %v743_v10 = vpop.f32.mrb[2].mxu1 }
 0x11f   :  { %v744_v11 = vpop.f32.mrb[3].mxu1 }
 0x120   :  { %v534_v12 = vadd.f32 %v742_v9, %v494_v7 }
 0x124   :  { %v613_v13 = vpop.f32.mrb[4].mxu1 }
 0x125   :  { %v774_v14 = vpop.f32.mrb[5].mxu1 }
 0x126   :  { %v616_v15 = vpop.f32.mrb[6].mxu1 }
 0x127   :  { %v775_v16 = vpop.f32.mrb[7].mxu1 }
 0x13a   :  { %v762_v18 = vpop.f32.mrb[4].mxu0 }
 0x13b   :  { %v763_v19 = vpop.f32.mrb[5].mxu0 }
 0x13c   :  { %v764_v21 = vadd.f32 %v763_v19, %v762_v18  ;;  %v765_v22 = vpop.f32.mrb[6].mxu0 }
 0x13d   :  { %v766_v23 = vpop.f32.mrb[7].mxu0 }
 0x13e   :  { %v574_v24 = vadd.f32 %v764_v21, %v534_v12 }
 0x140   :  { %v614_v25 = vadd.f32 %v613_v13, %v574_v24 }
 0x142   :  { %v622_v26 = vsel %vm621_vm2, %v614_v25, -inf }
 0x143   :  { %623 = vmax.xlane.f32.xlu0 %v622_v26 }
 0x1d0   :  { %v624_v27 = vpop.xlane.xlu0 %623 }
 0x1d1   :  { %v625_v28 = vsub.f32 %v622_v26, %v624_v27 }
 0x1d3   :  { %v626_v29 = vmul.f32 1.442695, %v625_v28 }
 0x1d5   :  { %832 = vpow2.f32 %v626_v29 }
 0x1df   :  { %v833_v30 = vpop.eup %832 }
 0x1e0   :  { %628 = vadd.xlane.f32.xlu0 %v833_v30 }
 0x26d   :  { %v629_v31 = vpop.xlane.xlu0 %628 }
 0x26e   :  { %834 = vlog2.f32 %v629_v31 }
 0x278   :  { %v835_v32 = vpop.eup %834 }
 0x279   :  { %v631_v33 = vmul.f32 0.6931472, %v835_v32 }
 0x27b   :  { %v632_v34 = vsub.f32 %v625_v28, %v631_v33 }
 0x27d   :  { %v633_v35 = vpack.c.bf16 %v632_v34, %v632_v34 }
 0x27f   :  { %634 = vst [vmem:[#allocation7] sm:$0xf] %v633_v35 }
 0x280   :  { %891 = shalt.err (!%p888_p6)
}
 0x281   :  { %s892_s15 = scalar_lea.hbm %s984_s3, 64 }
 0x282   :  { %p893_p7 = scmp.ne.s32.totalorder %s984_s3, %s892_s15  ;;  %p896_p8 = scmp.lt.u32.totalorder %s892_s15, %s984_s3 }
 0x284   :  { %p898_p9 = pnand %p896_p8, %p893_p7 }
 0x286   :  { %901 = shalt.err (!%p898_p9)
}
 0x287   :  { %644 = dma.vmem_to_hbm [thread:$0]  %s642_s11, 64, %s984_s3, [#allocation4]  }
 0x288   :  { %906 = dma.done.wait [#allocation4], 64  }
 0x289   :  { %907 = vsyncadd [#allocation4], 4294967232 }
 0x28a   :  { %648 = vsyncpa [#allocation3], 1 }
 0x28b   :  { %649 = vsyncpa [#allocation6], 1 }
 0x28c   :  { %650 = vsyncpa [#allocation4], 1 }

</bundles_post_ra>
